<compile_context>
chip_gen: v7x
topology: tpu7x:2x2x1
jax: 0.10.0
libtpu: 0.0.40
codegen_flags: <defaults>
</compile_context>

<pallas_src>
import math

import jax
import jax.numpy as jnp
from jax.experimental import pallas as pl
from jax.experimental.pallas import tpu as pltpu


def _vmem_budget_and_limit():
    """Generation-aware VMEM sizing.

    Returns (block_budget_bytes, vmem_limit_bytes):
      * block_budget_bytes: bytes the whole double-buffered working set
        (every block x 2 buffers) may occupy; tile sizes are derived from it.
      * vmem_limit_bytes: explicit scoped-VMEM limit for Mosaic (with headroom
        for compiler-internal scratch), so defaults never bind.
    Physical VMEM: 128 MiB (v5e/v6e), 64 MiB per TensorCore (v7x).
    """
    mib = 1024 * 1024
    try:
        cap = int(getattr(pltpu.get_tpu_info(), "vmem_capacity_bytes", 64 * mib))
    except Exception:  # be robust if the query is unavailable
        cap = 64 * mib
    # v7x (64 MiB)   -> limit 48 MiB, budget 40 MiB
    # v5e/v6e (128)  -> limit 64 MiB, budget 56 MiB
    limit = max(16 * mib, min((cap * 3) // 4, 64 * mib))
    budget = max(limit - 8 * mib, limit // 2)
    return budget, limit


def make_positional_encoding_table(d_model, max_len=5000, dtype=jnp.float32):
    """Sinusoidal table identical to the PyTorch `pe` buffer; shape (max_len, d_model).

    Built once at init; keep dtype=float32 to match PyTorch exactly (the buffer
    is float32 and the add promotes).  The forward wrapper never slices or
    casts it per call -- BlockSpec index_maps pick the needed rows.
    """
    pos = jnp.arange(max_len, dtype=jnp.float32)[:, None]                  # (max_len, 1)
    div_term = jnp.exp(
        jnp.arange(0, d_model, 2, dtype=jnp.float32) * (-math.log(10000.0) / d_model)
    )                                                                      # (ceil(D/2),)
    angles = pos * div_term                                                # (max_len, ceil(D/2))
    sin = jnp.sin(angles)
    cos = jnp.cos(angles)
    pe = jnp.zeros((max_len, d_model), dtype=jnp.float32)
    pe = pe.at[:, 0::2].set(sin[:, : (d_model + 1) // 2])
    pe = pe.at[:, 1::2].set(cos[:, : d_model // 2])     # guard: odd d_model truncates cos
    return pe.astype(dtype)


def _add_pe_kernel(x_ref, pe_ref, o_ref):
    # Shared body for all paths (leading-dim broadcast of the pe block):
    #   3D folded-batch: (B, TS, D) + (TS, D)  -> (B, TS, D)
    #   3D per-row     : (1, TS, D) + (TS, D)  -> (1, TS, D)
    #   flat           : (B, TF)    + (1, TF)  -> (B, TF)
    o_ref[...] = x_ref[...] + pe_ref[...]


def positional_encoding_forward(x, pe):
    """x: (B, S, D);  pe: (max_len, D) from make_positional_encoding_table."""
    B, S, D = x.shape
    max_len, d_pe = pe.shape
    assert d_pe == D and S <= max_len, "pe table does not cover this input"
    itemsize = jnp.dtype(x.dtype).itemsize
    sublane = max(8, 32 // itemsize)          # 8 for f32, 16 for bf16, 32 for int8
    budget, vmem_limit = _vmem_budget_and_limit()
    mib = 1024 * 1024

    if D % 128 == 0:
        # ---------------- 3D lane-dense path ----------------
        # Preferred: fold the whole batch into the block -> grid = (S_tiles,),
        # pe fetched exactly once per S-tile, minimal step count.
        # Per-step VMEM (2-deep buffered): x+out = 2*2*B*ts*D, pe = 2*ts*D.
        ts_fold = (budget // ((4 * B + 2) * D * itemsize)) // sublane * sublane
        if ts_fold >= sublane:
            ts = S if S <= ts_fold else ts_fold    # full-extent S is always legal
            # Megacore (v7x): if everything fits in one big step, split into two
            # parallel steps so both TensorCores stream HBM (only when each half
            # still carries >=4 MiB of traffic, i.e. per-step overhead stays tiny).
            step_bytes = 2 * B * ts * D * itemsize          # x read + out write
            if S <= ts and S >= 2 * sublane and step_bytes >= 8 * mib:
                half = (S + 1) // 2
                ts = ((half + sublane - 1) // sublane) * sublane
            grid = (pl.cdiv(S, ts),)
            return pl.pallas_call(
                _add_pe_kernel,
                out_shape=jax.ShapeDtypeStruct((B, S, D), x.dtype),
                grid_spec=pltpu.PrefetchScalarGridSpec(
                    num_scalar_prefetch=0,
                    grid=grid,
                    in_specs=[
                        pl.BlockSpec((B, ts, D), lambda s: (0, s, 0)),   # x tile
                        pl.BlockSpec((ts, D), lambda s: (s, 0)),         # pe tile
                    ],
                    out_specs=pl.BlockSpec((B, ts, D), lambda s: (0, s, 0)),
                ),
                compiler_params=pltpu.CompilerParams(
                    dimension_semantics=("parallel",),
                    vmem_limit_bytes=vmem_limit),
            )(x, pe)

        # Huge-B / huge-D fallback: per-batch-row blocks, batch innermost so
        # the pe block index is constant across b and re-used (not re-DMA'd).
        # Per-step VMEM: 6 * ts * D * itemsize (x, pe, out; all double-buffered).
        ts = (budget // (6 * D * itemsize)) // sublane * sublane
        ts = max(sublane, ts)
        ts = S if S <= ts else ts
        grid = (pl.cdiv(S, ts), B)
        return pl.pallas_call(
            _add_pe_kernel,
            out_shape=jax.ShapeDtypeStruct((B, S, D), x.dtype),
            grid_spec=pltpu.PrefetchScalarGridSpec(
                num_scalar_prefetch=0,
                grid=grid,
                in_specs=[
                    pl.BlockSpec((1, ts, D), lambda s, b: (b, s, 0)),    # x tile
                    pl.BlockSpec((ts, D), lambda s, b: (s, 0)),          # pe tile (const in b)
                ],
                out_specs=pl.BlockSpec((1, ts, D), lambda s, b: (b, s, 0)),
            ),
            compiler_params=pltpu.CompilerParams(
                dimension_semantics=("parallel", "parallel"),
                vmem_limit_bytes=vmem_limit),
        )(x, pe)

    # ---------------- folded lane-dense path (small / non-128-multiple D) ----------------
    F = S * D
    x2 = x.reshape(B, F)                      # contiguous collapse: no data movement
    pe2 = pe.reshape(1, max_len * D)          # contiguous collapse: no data movement
    # VMEM accounting WITH (sublane,128) native-tile padding: a (B, tf) block
    # physically occupies round_up(B, sublane)*tf words and the (1, tf) pe
    # block occupies sublane*tf words; everything is double-buffered.
    b_pad = ((B + sublane - 1) // sublane) * sublane
    tf_cap = budget // (2 * (2 * b_pad + sublane) * itemsize)
    tf_cap = max(128, (tf_cap // 128) * 128)
    if F % 128 == 0:
        tf = min(F, tf_cap)
    elif F > 128:
        tf = min((F // 128) * 128, tf_cap)    # ragged (masked) last flat tile
    else:
        tf = F                                # tiny fallback: full-dim lane block
        pe2 = pe2[:, :F]                      # tiny one-off slice so pe's block equals its full dim
    grid = (pl.cdiv(F, tf),)
    out2 = pl.pallas_call(
        _add_pe_kernel,
        out_shape=jax.ShapeDtypeStruct((B, F), x.dtype),
        grid_spec=pltpu.PrefetchScalarGridSpec(
            num_scalar_prefetch=0,
            grid=grid,
            in_specs=[
                pl.BlockSpec((B, tf), lambda f: (0, f)),                 # x flat tile
                pl.BlockSpec((1, tf), lambda f: (0, f)),                 # pe flat tile
            ],
            out_specs=pl.BlockSpec((B, tf), lambda f: (0, f)),
        ),
        compiler_params=pltpu.CompilerParams(
            dimension_semantics=("parallel",),
            vmem_limit_bytes=vmem_limit),
    )(x2, pe2)
    return out2.reshape(B, S, D)


if __name__ == "__main__":
    key = jax.random.PRNGKey(0)
    max_len = 64

    # --- demo shapes consistent with the module: batch=2, seq=8, d_model=32 ---
    B, S, D = 2, 8, 32
    x = jax.random.normal(key, (B, S, D), dtype=jnp.float32)
    pe = make_positional_encoding_table(D, max_len=max_len, dtype=jnp.float32)
    out = jax.block_until_ready(positional_encoding_forward(x, pe))       # folded path
    ref = x + pe[None, :S, :]
    assert out.shape == (B, S, D)
    assert jnp.allclose(out, ref, atol=1e-6, rtol=1e-6), "folded-path mismatch"

    # --- lane-dense 3D path (D multiple of 128, batch folded into the block) ---
    B2, S2, D2 = 2, 16, 128
    x2 = jax.random.normal(jax.random.PRNGKey(1), (B2, S2, D2), dtype=jnp.float32)
    pe2 = make_positional_encoding_table(D2, max_len=max_len, dtype=jnp.float32)
    out2 = jax.block_until_ready(positional_encoding_forward(x2, pe2))
    ref2 = x2 + pe2[None, :S2, :]
    assert jnp.allclose(out2, ref2, atol=1e-6, rtol=1e-6), "3D-path mismatch"

    # --- relaxed gate: 3D path with S NOT a sublane multiple (full-extent tile) ---
    B3, S3, D3 = 2, 10, 128
    x3 = jax.random.normal(jax.random.PRNGKey(2), (B3, S3, D3), dtype=jnp.float32)
    out3 = jax.block_until_ready(positional_encoding_forward(x3, pe2))
    ref3 = x3 + pe2[None, :S3, :]
    assert jnp.allclose(out3, ref3, atol=1e-6, rtol=1e-6), "ragged-S 3D-path mismatch"

    print("KERNEL_OK")
</pallas_src>

<mosaic_0001>
module attributes {stable_mosaic.version = 11 : i64} {
  func.func @_add_pe_kernel(%arg0: i32, %arg1: memref<2x256xf32, #tpu.memory_space<vmem>>, %arg2: memref<1x256xf32, #tpu.memory_space<vmem>>, %arg3: memref<2x256xf32, #tpu.memory_space<vmem>>) attributes {dimension_semantics = [#tpu.dimension_semantics<parallel>], iteration_bounds = array<i64: 1>, scalar_prefetch = 0 : i64, scratch_operands = 0 : i64, tpu.core_type = #tpu.core_type<tc>, window_params = [{transform_indices = @transform_0, window_bounds = array<i64: 2, 256>}, {transform_indices = @transform_1, window_bounds = array<i64: 1, 256>}, {transform_indices = @transform_2, window_bounds = array<i64: 2, 256>}]} {
    %c0 = arith.constant 0 : index
    %c0_0 = arith.constant 0 : index
    %0 = vector.load %arg1[%c0, %c0_0] : memref<2x256xf32, #tpu.memory_space<vmem>>, vector<2x256xf32>
    %c0_1 = arith.constant 0 : index
    %c0_2 = arith.constant 0 : index
    %1 = vector.load %arg2[%c0_1, %c0_2] : memref<1x256xf32, #tpu.memory_space<vmem>>, vector<1x256xf32>
    %2 = vector.broadcast %1 : vector<1x256xf32> to vector<2x256xf32>
    %3 = arith.addf %0, %2 : vector<2x256xf32>
    %c0_3 = arith.constant 0 : index
    %c0_4 = arith.constant 0 : index
    %4 = vector.load %arg3[%c0_3, %c0_4] : memref<2x256xf32, #tpu.memory_space<vmem>>, vector<2x256xf32>
    tpu.vector_store %arg3[%c0_3, %c0_4], %3 {strides = array<i32>} : memref<2x256xf32, #tpu.memory_space<vmem>>, vector<2x256xf32>,
    return
  }
  func.func @transform_0(%arg0: i32) -> (i32, i32) {
    %c0_i32 = arith.constant 0 : i32
    %c0_i32_0 = arith.constant 0 : i32
    return %c0_i32, %arg0 : i32, i32
  }
  func.func @transform_1(%arg0: i32) -> (i32, i32) {
    %c0_i32 = arith.constant 0 : i32
    %c0_i32_0 = arith.constant 0 : i32
    return %c0_i32, %arg0 : i32, i32
  }
  func.func @transform_2(%arg0: i32) -> (i32, i32) {
    %c0_i32 = arith.constant 0 : i32
    %c0_i32_0 = arith.constant 0 : i32
    return %c0_i32, %arg0 : i32, i32
  }
}

</mosaic_0001>

<bundles_post_ra>
// kernel: tpu_custom_call.1
= control target key start
LH: loop header
LB: loop body
LE: loop exit
PB: predicated region body
PF: predicated region fallthrough
CT: control target
= control target key end

     0   :  { %7 = vsyncpa [#allocation3], 0  ;;  %s215_s0 = inlined_call_operand.hbm [shape: f32[2,256], index: 0, kind: input, shape index: {}]   ;;  %s216_s1 = inlined_call_operand.hbm [shape: f32[1,2048], index: 1, kind: input, shape index: {}]   ;;  %s217_s2 = inlined_call_operand.hbm [shape: f32[2,256], index: 2, kind: output, shape index: {}]  }
   0x1   :  { %8 = vsyncpa [#allocation6], 0 }
   0x2   :  { %9 = vsyncpa [#allocation4], 0  ;;  %s150_s9 = smov [#allocation2]   ;;  %s151_s11 = smov [#allocation5]  }
   0x3   :  { %s16_s10 = sshll.u32 %s150_s9, 4  ;;  %s26_s12 = sshll.u32 %s151_s11, 4  ;;  %s17_s10 = int_to_ptr.vmem [resolvable:$true] %s16_s10  ;;  %s169_s12 = int_to_ptr.vmem [resolvable:$true] %s26_s12 }
   0x4   :  { %s78_s15 = scalar_lea.hbm %s215_s0, 64 }
   0x5   :  { %p79_p0 = scmp.ne.s32.totalorder %s215_s0, %s78_s15  ;;  %p82_p1 = scmp.lt.u32.totalorder %s78_s15, %s215_s0 }
   0x7   :  { %p84_p2 = pnand %p82_p1, %p79_p0 }
   0x9   :  { %87 = shalt.err (!%p84_p2)
}
   0xa   :  { %s88_s20 = scalar_lea.vmem %s17_s10, 64  ;;  %p93_p4 = scmp.lt.s32.totalorder %s17_s10, %s17_s10 }
   0xb   :  { %p89_p3 = scmp.ne.s32.totalorder %s17_s10, %s88_s20  ;;  %p94_p5 = scmp.lt.s32.totalorder %s88_s20, %s88_s20 }
   0xd   :  { %p95_p6 = por %p94_p5, %p93_p4 }
   0xf   :  { %p96_p7 = pnand %p95_p6, %p89_p3 }
  0x11   :  { %99 = shalt.err (!%p96_p7)
}
  0x12   :  { %19 = dma.hbm_to_vmem [thread:$0]  %s215_s0, 64, %s17_s10, [#allocation3]  }
  0x13   :  { %s100_s25 = scalar_lea.hbm %s216_s1, 32  ;;  %s102_s30 = scalar_lea.hbm %s216_s1, 256 }
  0x14   :  { %p101_p8 = scmp.ne.s32.totalorder %s216_s1, %s100_s25  ;;  %p103_p9 = scmp.lt.u32.totalorder %s102_s30, %s100_s25 }
  0x15   :  { %p104_p10 = scmp.lt.u32.totalorder %s100_s25, %s216_s1 }
  0x17   :  { %p105_p11 = por %p104_p10, %p103_p9 }
  0x19   :  { %p106_p12 = pnand %p105_p11, %p101_p8 }
  0x1b   :  { %109 = shalt.err (!%p106_p12)
}
  0x1c   :  { %s110_s0 = scalar_lea.vmem %s169_s12, 32  ;;  %p115_p0 = scmp.lt.s32.totalorder %s169_s12, %s169_s12 }
  0x1d   :  { %p111_p13 = scmp.ne.s32.totalorder %s169_s12, %s110_s0  ;;  %p116_p1 = scmp.lt.s32.totalorder %s110_s0, %s110_s0 }
  0x1f   :  { %p117_p2 = por %p116_p1, %p115_p0 }
  0x21   :  { %p118_p3 = pnand %p117_p2, %p111_p13 }
  0x23   :  { %121 = shalt.err (!%p118_p3)
}
  0x24   :  { %29 = dma.hbm_to_vmem [thread:$0]  %s216_s1, 32, %s169_s12, [#allocation6]  }
  0x25   :  { %144 = dma.done.wait [#allocation3], 64  }
  0x26   :  { %145 = vsyncadd [#allocation3], 4294967232 }
  0x27   :  { %146 = dma.done.wait [#allocation6], 32  }
  0x28   :  { %147 = vsyncadd [#allocation6], 4294967264  ;;  %v39_v0 = vlaneseq  ;;  %v152_v1 = vmov 1983009808   ;;  %v37_v7 = vld [vmem:[#allocation5] sm:$0x3] }
  0x29   :  { %v49_v2 = vunpack.c.l.s4 %v152_v1  ;;  %v36_v12 = vld [vmem:[#allocation2] sm:$0xf]  ;;  %s153_s7 = smov [#allocation7]  }
  0x2a   :  { %v40_v3 = vshrl.u32 %v39_v0, 7  ;;  %s64_s8 = sshll.u32 %s153_s7, 4  ;;  %s65_s8 = int_to_ptr.vmem [resolvable:$true] %s64_s8 }
  0x2b   :  { %v50_v6 = vunpack.c.0.s8 %v49_v2  ;;  %s122_s1 = scalar_lea.vmem %s65_s8, 64  ;;  %p127_p5 = scmp.lt.s32.totalorder %s65_s8, %s65_s8 }
  0x2c   :  { %v41_v4 = vsub.s32 0, %v40_v3  ;;  %v45_v5 = vsub.s32 1, %v40_v3  ;;  %p123_p4 = scmp.ne.s32.totalorder %s65_s8, %s122_s1  ;;  %p128_p6 = scmp.lt.s32.totalorder %s122_s1, %s122_s1 }
  0x2d   :  { %v53_v10 = vsub.s32 %v50_v6, %v40_v3 }
  0x2e   :  { %v42_v8 = vrot.slane %v37_v7, %v41_v4  ;;  %v46_v9 = vrot.slane %v37_v7, %v45_v5  ;;  %p129_p7 = por %p128_p6, %p127_p5 }
  0x30   :  { %v47_v11 = vcombine.low %v42_v8, %v46_v9  ;;  %p130_p8 = pnand %p129_p7, %p123_p4 }
  0x32   :  { %v54_v13 = vrot.slane %v47_v11, %v53_v10 }
  0x34   :  { %v56_v14 = vadd.f32 %v54_v13, %v36_v12 }
  0x36   :  { %57 = vst [vmem:[#allocation7] sm:$0xf] %v56_v14 }
  0x37   :  { %133 = shalt.err (!%p130_p8)
}
  0x38   :  { %s134_s11 = scalar_lea.hbm %s217_s2, 64 }
  0x39   :  { %p135_p9 = scmp.ne.s32.totalorder %s217_s2, %s134_s11  ;;  %p138_p10 = scmp.lt.u32.totalorder %s134_s11, %s217_s2 }
  0x3b   :  { %p140_p11 = pnand %p138_p10, %p135_p9 }
  0x3d   :  { %143 = shalt.err (!%p140_p11)
}
  0x3e   :  { %67 = dma.vmem_to_hbm [thread:$0]  %s65_s8, 64, %s217_s2, [#allocation4]  }
  0x3f   :  { %148 = dma.done.wait [#allocation4], 64  }
  0x40   :  { %149 = vsyncadd [#allocation4], 4294967232 }
  0x41   :  { %71 = vsyncpa [#allocation3], 1 }
  0x42   :  { %72 = vsyncpa [#allocation6], 1 }
  0x43   :  { %73 = vsyncpa [#allocation4], 1 }

</bundles_post_ra>
